<compile_context>
chip_gen: v5e
topology: v5e:2x2
jax: 0.10.0
libtpu: 0.0.40
codegen_flags: <defaults>
</compile_context>

<pallas_src>
import jax
import jax.numpy as jnp
from jax import lax
from jax.experimental import pallas as pl
from jax.experimental.pallas import tpu as pltpu

LN_EPS = 1e-5  # torch.nn.LayerNorm default


def _make_kernel(dim, n_img, tq, compute_dtype, masked, use_txt_scratch, approx_recip):
    """dim=D, n_img=Ni (for masking), tq=query-tile rows, masked=last query tile is partial."""

    def kernel(img_ref, txt_ref, wqv_ref, bqv_ref, wkv_ref, bkv_ref,
               img_out_ref, txt_out_ref, kv_sc, *opt_scratch):
        qi = pl.program_id(1)
        txt_acc = opt_scratch[0] if use_txt_scratch else txt_out_ref

        def norm(x):  # (bt, R, D) f32 -> (x - mu) * rsqrt(var + eps); affine folded into weights
            mu = jnp.mean(x, axis=-1, keepdims=True)
            var = jnp.mean(jnp.square(x - mu), axis=-1, keepdims=True)  # biased, like torch
            return (x - mu) * lax.rsqrt(var + LN_EPS)

        def project(x, w_ref, b_ref):  # (bt, R, D) f32 -> (bt, R, 2D) f32; bf16 MXU, f32 acc
            bt_, r, _ = x.shape
            y = jnp.dot(x.reshape(bt_ * r, dim).astype(compute_dtype), w_ref[...],
                        preferred_element_type=jnp.float32) + b_ref[...]
            return y.reshape(bt_, r, 2 * dim)

        # --- once per batch block: LN(text) + fused [K|V] projection into VMEM scratch ---
        @pl.when(qi == 0)
        def _():
            txt = txt_ref[...].astype(jnp.float32)                       # (bt, Nt, D)
            kv_sc[...] = project(norm(txt), wkv_ref, bkv_ref).astype(compute_dtype)
            txt_acc[...] = jnp.zeros(txt_acc.shape, txt_acc.dtype)

        # --- per query tile: LN(image tile) + fused [Q|V] projection (scale/affine pre-folded) ---
        img = img_ref[...].astype(jnp.float32)                           # (bt, tq, D)
        if masked:  # zero padded rows of the partial last tile so everything stays finite
            rows = qi * tq + lax.broadcasted_iota(jnp.int32, (1, tq, 1), 1)
            img = jnp.where(rows < n_img, img, 0.0)

        qv = project(norm(img), wqv_ref, bqv_ref)                        # (bt, tq, 2D) f32
        q = qv[..., :dim].astype(compute_dtype)                          # (bt, tq, D), pre-scaled
        v_img = qv[..., dim:].astype(compute_dtype)                      # (bt, tq, D)

        kv = kv_sc[...]                                                  # (bt, Nt, 2D)
        k, v = kv[..., :dim], kv[..., dim:]

        # Scores in the transposed, lane-dense layout (bt, Nt, tq); softmax over the key axis (1).
        s_t = jnp.einsum("bkd,bqd->bkq", k, q, preferred_element_type=jnp.float32)
        s_t = s_t - jnp.max(s_t, axis=1, keepdims=True)                  # stable softmax
        e = jnp.exp(s_t)
        denom = jnp.sum(e, axis=1, keepdims=True)
        if approx_recip:
            attn_t = e * pl.reciprocal(denom, approx=True)               # EUP slot, ~free
        else:
            attn_t = e / denom
        if masked:  # padded query columns must contribute nothing to the text reduction
            cols = qi * tq + lax.broadcasted_iota(jnp.int32, (1, 1, tq), 2)
            attn_t = jnp.where(cols < n_img, attn_t, 0.0)
        attn_t = attn_t.astype(compute_dtype)

        img_out_ref[...] = jnp.einsum(
            "bkq,bkd->bqd", attn_t, v,
            preferred_element_type=jnp.float32).astype(img_out_ref.dtype)

        # text_out = attn^T @ v_img: reduction over query tiles, f32-accumulated.
        txt_acc[...] += jnp.einsum("bkq,bqd->bkd", attn_t, v_img,
                                   preferred_element_type=jnp.float32)

        if use_txt_scratch:
            @pl.when(qi == pl.num_programs(1) - 1)
            def _():
                txt_out_ref[...] = txt_acc[...].astype(txt_out_ref.dtype)

    return kernel


def _pick_query_tile(n_img, tq_req):
    """Largest safe query tile: a multiple-of-8 exact divisor if possible, else cdiv + masking."""
    tq_req = max(8, min(int(tq_req), 1024))
    tq_req -= tq_req % 8
    if n_img <= tq_req:
        return n_img, False                       # single full tile (full-dim block always legal)
    divisors = [d for d in range(8, tq_req + 1, 8) if n_img % d == 0]
    if divisors:
        return max(divisors), False
    return tq_req, True                           # cdiv grid, masked partial last tile


def _pick_batch_block(batch, tq_eff, target_rows=512):
    """Densest grid step without starving the 2nd TensorCore (keep >=2 batch blocks when B>=2)."""
    if batch <= 1 or tq_eff >= target_rows:
        return 1
    max_bt = max(1, min(target_rows // tq_eff, batch // 2))
    return max(d for d in range(1, max_bt + 1) if batch % d == 0)


def cross_attention(image_features, text_features, params, *, tq=512,
                    compute_dtype=jnp.bfloat16, out_dtype=None,
                    approx_reciprocal=True, single_buffer_weights=False):
    """image_features: (B, Ni, D), text_features: (B, Nt, D) -> (image_out, text_out).

    At D ~ 128 the kernel is HBM-bandwidth bound: pass bf16 image/text arrays and/or
    out_dtype=jnp.bfloat16 to halve HBM traffic (LayerNorm / softmax stay f32 in-register).
    """
    B, Ni, D = image_features.shape
    b_txt, Nt, d_txt = text_features.shape
    assert b_txt == B and d_txt == D, "batch / feature dims must match"
    scale = float(D) ** -0.5

    img_out_dtype = jnp.dtype(out_dtype or image_features.dtype)
    txt_out_dtype = jnp.dtype(out_dtype or text_features.dtype)
    use_txt_scratch = txt_out_dtype != jnp.dtype(jnp.float32)

    tq_eff, masked = _pick_query_tile(Ni, tq)
    n_q = pl.cdiv(Ni, tq_eff)
    bt = _pick_batch_block(B, tq_eff)
    n_b = B // bt

    # Fused, pre-transposed projections (torch (out,in) -> (in,out)); both the softmax scale and
    # the LayerNorm affine are folded in on the host:
    #   LN(x) @ W + b = z @ (diag(gamma) @ W) + (beta @ W + b),  z = (x - mu) * rsqrt(var + eps)
    f32 = jnp.float32
    gamma = params["ln_gamma"].astype(f32)
    beta = params["ln_beta"].astype(f32)
    wqv = jnp.concatenate([params["wq"].T.astype(f32) * scale, params["wv"].T.astype(f32)], axis=1)
    wkv = jnp.concatenate([params["wk"].T.astype(f32), params["wv"].T.astype(f32)], axis=1)
    bqv = jnp.concatenate([params["bq"].astype(f32) * scale, params["bv"].astype(f32)])
    bkv = jnp.concatenate([params["bk"].astype(f32), params["bv"].astype(f32)])
    wqv_f = (gamma[:, None] * wqv).astype(compute_dtype)                 # (D, 2D)
    wkv_f = (gamma[:, None] * wkv).astype(compute_dtype)                 # (D, 2D)
    bqv_f = (beta @ wqv + bqv).reshape(1, 2 * D).astype(f32)             # (1, 2D)
    bkv_f = (beta @ wkv + bkv).reshape(1, 2 * D).astype(f32)             # (1, 2D)

    # Grid-invariant operands: constant index_map -> Pallas skips re-DMA between grid steps.
    def _const_spec(shape):
        idx = lambda b, q: tuple(0 for _ in shape)
        if single_buffer_weights:
            try:  # halves the weights' VMEM footprint; only matters at large D (v7x: 64 MiB VMEM)
                return pl.BlockSpec(shape, idx, pipeline_mode=pl.Buffered(1))
            except TypeError:
                pass
        return pl.BlockSpec(shape, idx)

    # Explicit scoped-VMEM sizing with ~20% headroom under physical capacity
    # (v5e/v6e: 128 MiB -> allow > 64 MiB; v7x: 64 MiB -> stay well under it).
    isz = lambda dt: jnp.dtype(dt).itemsize
    est = 0
    est += 2 * bt * tq_eff * D * (isz(image_features.dtype) + isz(img_out_dtype))  # image in/out, dbl-buf
    est += 2 * bt * Nt * D * (isz(text_features.dtype) + isz(txt_out_dtype))       # text in/out, dbl-buf
    est += (1 if single_buffer_weights else 2) * 2 * (D * 2 * D) * isz(compute_dtype)  # wqv + wkv
    est += 4 * (2 * D) * 4                                                          # biases
    est += bt * Nt * 2 * D * isz(compute_dtype) + bt * Nt * D * 4                   # K|V scratch + f32 acc
    try:
        phys = int(getattr(pltpu.get_tpu_info(), "vmem_capacity_bytes", 0)) or (64 << 20)
    except Exception:
        phys = 64 << 20
    vmem_limit = int(min(max(2 * est, 32 << 20), int(phys * 0.8)))

    scratch_shapes = [pltpu.VMEM((bt, Nt, 2 * D), compute_dtype)]        # K|V for current batch block
    if use_txt_scratch:
        scratch_shapes.append(pltpu.VMEM((bt, Nt, D), jnp.float32))      # text_out f32 accumulator

    out = pl.pallas_call(
        _make_kernel(D, Ni, tq_eff, compute_dtype, masked, use_txt_scratch, approx_reciprocal),
        out_shape=(
            jax.ShapeDtypeStruct((B, Ni, D), img_out_dtype),
            jax.ShapeDtypeStruct((B, Nt, D), txt_out_dtype),
        ),
        grid_spec=pltpu.PrefetchScalarGridSpec(
            num_scalar_prefetch=0,
            grid=(n_b, n_q),
            in_specs=[
                pl.BlockSpec((bt, tq_eff, D), lambda b, q: (b, q, 0)),   # image query tile
                pl.BlockSpec((bt, Nt, D), lambda b, q: (b, 0, 0)),       # full text block
                _const_spec((D, 2 * D)), _const_spec((1, 2 * D)),        # [Wq*scale | Wv] (LN folded), bias
                _const_spec((D, 2 * D)), _const_spec((1, 2 * D)),        # [Wk | Wv] (LN folded), bias
            ],
            out_specs=[
                pl.BlockSpec((bt, tq_eff, D), lambda b, q: (b, q, 0)),   # image_out tile
                pl.BlockSpec((bt, Nt, D), lambda b, q: (b, 0, 0)),       # text_out (resident over q)
            ],
            scratch_shapes=scratch_shapes,
        ),
        compiler_params=pltpu.CompilerParams(
            # q-axis carries the text_out reduction -> "arbitrary"; batch blocks are parallel.
            dimension_semantics=("parallel", "arbitrary"),
            vmem_limit_bytes=vmem_limit,
        ),
    )(image_features, text_features, wqv_f, bqv_f, wkv_f, bkv_f)
    return out


def reference(image_features, text_features, params):
    """Pure-JAX f32 reference mirroring the PyTorch module."""
    D = image_features.shape[-1]
    scale = float(D) ** -0.5

    def layer_norm(x):
        mu = jnp.mean(x, axis=-1, keepdims=True)
        var = jnp.mean((x - mu) ** 2, axis=-1, keepdims=True)
        return (x - mu) / jnp.sqrt(var + LN_EPS) * params["ln_gamma"] + params["ln_beta"]

    def linear(x, w, b):  # w is torch-style (out, in)
        return x @ w.T + b

    img_n = layer_norm(image_features)
    txt_n = layer_norm(text_features)
    q = linear(img_n, params["wq"], params["bq"])
    k = linear(txt_n, params["wk"], params["bk"])
    v = linear(txt_n, params["wv"], params["bv"])
    attn = jax.nn.softmax(jnp.einsum("bid,bjd->bij", q, k) * scale, axis=-1)
    image_out = jnp.einsum("bij,bjd->bid", attn, v)
    text_out = jnp.einsum("bij,bid->bjd", attn, linear(img_n, params["wv"], params["bv"]))
    return image_out, text_out


def init_params(key, dim):
    ks = jax.random.split(key, 6)
    bound = dim ** -0.5
    return {
        "wq": jax.random.uniform(ks[0], (dim, dim), jnp.float32, -bound, bound),
        "bq": jax.random.uniform(ks[1], (dim,), jnp.float32, -bound, bound),
        "wk": jax.random.uniform(ks[2], (dim, dim), jnp.float32, -bound, bound),
        "bk": jax.random.uniform(ks[3], (dim,), jnp.float32, -bound, bound),
        "wv": jax.random.uniform(ks[4], (dim, dim), jnp.float32, -bound, bound),
        "bv": jax.random.uniform(ks[5], (dim,), jnp.float32, -bound, bound),
        "ln_gamma": jnp.ones((dim,), jnp.float32),
        "ln_beta": jnp.zeros((dim,), jnp.float32),
    }


if __name__ == "__main__":
    key = jax.random.PRNGKey(0)
    k_img, k_txt, k_param, k_img2, k_img3, k_txt3 = jax.random.split(key, 6)
    D = 128
    params = init_params(k_param, D)

    # 1) Small demo shape (single query tile per batch element).
    B, Ni, Nt = 2, 16, 8
    image_features = jax.random.normal(k_img, (B, Ni, D), jnp.float32)
    text_features = jax.random.normal(k_txt, (B, Nt, D), jnp.float32)
    img_out, txt_out = jax.block_until_ready(
        cross_attention(image_features, text_features, params))
    ref_img, ref_txt = reference(image_features, text_features, params)
    assert jnp.allclose(img_out, ref_img, atol=3e-2, rtol=3e-2), "image_out mismatch (case 1)"
    assert jnp.allclose(txt_out, ref_txt, atol=3e-2, rtol=3e-2), "text_out mismatch (case 1)"

    # 2) Multi-tile query axis with a masked partial last tile: Ni=76, tq=32 -> 3 query tiles.
    Ni2 = 76
    image2 = jax.random.normal(k_img2, (B, Ni2, D), jnp.float32)
    img2_out, txt2_out = jax.block_until_ready(
        cross_attention(image2, text_features, params, tq=32))
    ref_img2, ref_txt2 = reference(image2, text_features, params)
    assert jnp.allclose(img2_out, ref_img2, atol=5e-2, rtol=5e-2), "image_out mismatch (case 2)"
    assert jnp.allclose(txt2_out, ref_txt2, atol=5e-2, rtol=5e-2), "text_out mismatch (case 2)"

    # 3) Batch-blocked path: B=8 -> 4 batch elements per grid step, 2 parallel grid steps.
    B3 = 8
    image3 = jax.random.normal(k_img3, (B3, Ni, D), jnp.float32)
    text3 = jax.random.normal(k_txt3, (B3, Nt, D), jnp.float32)
    img3_out, txt3_out = jax.block_until_ready(cross_attention(image3, text3, params))
    ref_img3, ref_txt3 = reference(image3, text3, params)
    assert jnp.allclose(img3_out, ref_img3, atol=3e-2, rtol=3e-2), "image_out mismatch (case 3)"
    assert jnp.allclose(txt3_out, ref_txt3, atol=3e-2, rtol=3e-2), "text_out mismatch (case 3)"

    print("KERNEL_OK")
</pallas_src>

<mosaic_0001>
module attributes {stable_mosaic.version = 11 : i64} {
  func.func @kernel(%arg0: i32, %arg1: i32, %arg2: memref<1x16x128xf32, #tpu.memory_space<vmem>>, %arg3: memref<1x8x128xf32, #tpu.memory_space<vmem>>, %arg4: memref<128x256xbf16, #tpu.memory_space<vmem>>, %arg5: memref<1x256xf32, #tpu.memory_space<vmem>>, %arg6: memref<128x256xbf16, #tpu.memory_space<vmem>>, %arg7: memref<1x256xf32, #tpu.memory_space<vmem>>, %arg8: memref<1x16x128xf32, #tpu.memory_space<vmem>>, %arg9: memref<1x8x128xf32, #tpu.memory_space<vmem>>, %arg10: memref<1x8x256xbf16, #tpu.memory_space<vmem>>) attributes {dimension_semantics = [#tpu.dimension_semantics<parallel>, #tpu.dimension_semantics<arbitrary>], iteration_bounds = array<i64: 2, 1>, scalar_prefetch = 0 : i64, scratch_operands = 1 : i64, tpu.core_type = #tpu.core_type<tc>, window_params = [{transform_indices = @transform_0, window_bounds = array<i64: 1, 16, 128>}, {transform_indices = @transform_1, window_bounds = array<i64: 1, 8, 128>}, {pipeline_mode = #tpu.pipeline_mode<synchronous>, transform_indices = @transform_2, window_bounds = array<i64: 128, 256>}, {pipeline_mode = #tpu.pipeline_mode<synchronous>, transform_indices = @transform_3, window_bounds = array<i64: 1, 256>}, {pipeline_mode = #tpu.pipeline_mode<synchronous>, transform_indices = @transform_4, window_bounds = array<i64: 128, 256>}, {pipeline_mode = #tpu.pipeline_mode<synchronous>, transform_indices = @transform_5, window_bounds = array<i64: 1, 256>}, {transform_indices = @transform_6, window_bounds = array<i64: 1, 16, 128>}, {transform_indices = @transform_7, window_bounds = array<i64: 1, 8, 128>}]} {
    %c0_i32 = arith.constant 0 : i32
    %0 = arith.cmpi eq, %arg1, %c0_i32 : i32
    %1 = arith.extui %0 : i1 to i32
    %c0_i32_0 = arith.constant 0 : i32
    %2 = arith.cmpi ne, %1, %c0_i32_0 : i32
    scf.if %2 {
      %c0_29 = arith.constant 0 : index
      %c0_30 = arith.constant 0 : index
      %c0_31 = arith.constant 0 : index
      %55 = vector.load %arg3[%c0_29, %c0_30, %c0_31] : memref<1x8x128xf32, #tpu.memory_space<vmem>>, vector<1x8x128xf32>
      %cst_32 = arith.constant dense<0.000000e+00> : vector<1x8xf32>
      %56 = vector.multi_reduction <add>, %55, %cst_32 [2] : vector<1x8x128xf32> to vector<1x8xf32>
      %57 = vector.shape_cast %56 : vector<1x8xf32> to vector<1x8x1xf32>
      %cst_33 = arith.constant 1.280000e+02 : f32
      %58 = vector.broadcast %cst_33 : f32 to vector<1x8x1xf32>
      %59 = arith.divf %57, %58 : vector<1x8x1xf32>
      %60 = vector.broadcast %59 : vector<1x8x1xf32> to vector<1x8x128xf32>
      %61 = arith.subf %55, %60 : vector<1x8x128xf32>
      %62 = arith.mulf %61, %61 : vector<1x8x128xf32>
      %cst_34 = arith.constant dense<0.000000e+00> : vector<1x8xf32>
      %63 = vector.multi_reduction <add>, %62, %cst_34 [2] : vector<1x8x128xf32> to vector<1x8xf32>
      %64 = vector.shape_cast %63 : vector<1x8xf32> to vector<1x8x1xf32>
      %cst_35 = arith.constant 1.280000e+02 : f32
      %65 = vector.broadcast %cst_35 : f32 to vector<1x8x1xf32>
      %66 = arith.divf %64, %65 : vector<1x8x1xf32>
      %67 = vector.broadcast %59 : vector<1x8x1xf32> to vector<1x8x128xf32>
      %68 = arith.subf %55, %67 : vector<1x8x128xf32>
      %cst_36 = arith.constant 9.99999974E-6 : f32
      %69 = vector.broadcast %cst_36 : f32 to vector<1x8x1xf32>
      %70 = arith.addf %66, %69 : vector<1x8x1xf32>
      %71 = math.rsqrt %70 : vector<1x8x1xf32>
      %72 = vector.broadcast %71 : vector<1x8x1xf32> to vector<1x8x128xf32>
      %73 = arith.mulf %68, %72 : vector<1x8x128xf32>
      %74 = vector.shape_cast %73 : vector<1x8x128xf32> to vector<8x128xf32>
      %75 = arith.truncf %74 : vector<8x128xf32> to vector<8x128xbf16>
      %c0_37 = arith.constant 0 : index
      %c0_38 = arith.constant 0 : index
      %76 = vector.load %arg6[%c0_37, %c0_38] : memref<128x256xbf16, #tpu.memory_space<vmem>>, vector<128x256xbf16>
      %cst_39 = arith.constant dense<0.000000e+00> : vector<8x256xf32>
      %77 = tpu.matmul %75, %76, %cst_39 {dimension_numbers = #tpu.dot_dimension_numbers<[1], [0], [0], [1], [0, 0, 1, 1], [], []>} : vector<8x128xbf16>, vector<128x256xbf16>, vector<8x256xf32> -> vector<8x256xf32>
      %c0_40 = arith.constant 0 : index
      %c0_41 = arith.constant 0 : index
      %78 = vector.load %arg7[%c0_40, %c0_41] : memref<1x256xf32, #tpu.memory_space<vmem>>, vector<1x256xf32>
      %79 = vector.broadcast %78 : vector<1x256xf32> to vector<8x256xf32>
      %80 = arith.addf %77, %79 : vector<8x256xf32>
      %81 = vector.shape_cast %80 : vector<8x256xf32> to vector<1x8x256xf32>
      %82 = arith.truncf %81 : vector<1x8x256xf32> to vector<1x8x256xbf16>
      %c0_42 = arith.constant 0 : index
      %c0_43 = arith.constant 0 : index
      %c0_44 = arith.constant 0 : index
      %83 = vector.load %arg10[%c0_42, %c0_43, %c0_44] : memref<1x8x256xbf16, #tpu.memory_space<vmem>>, vector<1x8x256xbf16>
      tpu.vector_store %arg10[%c0_42, %c0_43, %c0_44], %82 {strides = array<i32>} : memref<1x8x256xbf16, #tpu.memory_space<vmem>>, vector<1x8x256xbf16>,
      %cst_45 = arith.constant 0.000000e+00 : f32
      %84 = vector.broadcast %cst_45 : f32 to vector<1x8x128xf32>
      %c0_46 = arith.constant 0 : index
      %c0_47 = arith.constant 0 : index
      %c0_48 = arith.constant 0 : index
      %85 = vector.load %arg9[%c0_46, %c0_47, %c0_48] : memref<1x8x128xf32, #tpu.memory_space<vmem>>, vector<1x8x128xf32>
      tpu.vector_store %arg9[%c0_46, %c0_47, %c0_48], %84 {strides = array<i32>} : memref<1x8x128xf32, #tpu.memory_space<vmem>>, vector<1x8x128xf32>,
    } else {
    }
    %c0 = arith.constant 0 : index
    %c0_1 = arith.constant 0 : index
    %c0_2 = arith.constant 0 : index
    %3 = vector.load %arg2[%c0, %c0_1, %c0_2] : memref<1x16x128xf32, #tpu.memory_space<vmem>>, vector<1x16x128xf32>
    %cst = arith.constant dense<0.000000e+00> : vector<1x16xf32>
    %4 = vector.multi_reduction <add>, %3, %cst [2] : vector<1x16x128xf32> to vector<1x16xf32>
    %5 = vector.shape_cast %4 : vector<1x16xf32> to vector<1x16x1xf32>
    %cst_3 = arith.constant 1.280000e+02 : f32
    %6 = vector.broadcast %cst_3 : f32 to vector<1x16x1xf32>
    %7 = arith.divf %5, %6 : vector<1x16x1xf32>
    %8 = vector.broadcast %7 : vector<1x16x1xf32> to vector<1x16x128xf32>
    %9 = arith.subf %3, %8 : vector<1x16x128xf32>
    %10 = arith.mulf %9, %9 : vector<1x16x128xf32>
    %cst_4 = arith.constant dense<0.000000e+00> : vector<1x16xf32>
    %11 = vector.multi_reduction <add>, %10, %cst_4 [2] : vector<1x16x128xf32> to vector<1x16xf32>
    %12 = vector.shape_cast %11 : vector<1x16xf32> to vector<1x16x1xf32>
    %cst_5 = arith.constant 1.280000e+02 : f32
    %13 = vector.broadcast %cst_5 : f32 to vector<1x16x1xf32>
    %14 = arith.divf %12, %13 : vector<1x16x1xf32>
    %15 = vector.broadcast %7 : vector<1x16x1xf32> to vector<1x16x128xf32>
    %16 = arith.subf %3, %15 : vector<1x16x128xf32>
    %cst_6 = arith.constant 9.99999974E-6 : f32
    %17 = vector.broadcast %cst_6 : f32 to vector<1x16x1xf32>
    %18 = arith.addf %14, %17 : vector<1x16x1xf32>
    %19 = math.rsqrt %18 : vector<1x16x1xf32>
    %20 = vector.broadcast %19 : vector<1x16x1xf32> to vector<1x16x128xf32>
    %21 = arith.mulf %16, %20 : vector<1x16x128xf32>
    %22 = vector.shape_cast %21 : vector<1x16x128xf32> to vector<16x128xf32>
    %23 = arith.truncf %22 : vector<16x128xf32> to vector<16x128xbf16>
    %c0_7 = arith.constant 0 : index
    %c0_8 = arith.constant 0 : index
    %24 = vector.load %arg4[%c0_7, %c0_8] : memref<128x256xbf16, #tpu.memory_space<vmem>>, vector<128x256xbf16>
    %cst_9 = arith.constant dense<0.000000e+00> : vector<16x256xf32>
    %25 = tpu.matmul %23, %24, %cst_9 {dimension_numbers = #tpu.dot_dimension_numbers<[1], [0], [0], [1], [0, 0, 1, 1], [], []>} : vector<16x128xbf16>, vector<128x256xbf16>, vector<16x256xf32> -> vector<16x256xf32>
    %c0_10 = arith.constant 0 : index
    %c0_11 = arith.constant 0 : index
    %26 = vector.load %arg5[%c0_10, %c0_11] : memref<1x256xf32, #tpu.memory_space<vmem>>, vector<1x256xf32>
    %27 = vector.broadcast %26 : vector<1x256xf32> to vector<16x256xf32>
    %28 = arith.addf %25, %27 : vector<16x256xf32>
    %29 = vector.shape_cast %28 : vector<16x256xf32> to vector<1x16x256xf32>
    %30 = vector.extract_strided_slice %29 {offsets = [0, 0, 0], sizes = [1, 16, 128], strides = [1, 1, 1]} : vector<1x16x256xf32> to vector<1x16x128xf32>
    %31 = arith.truncf %30 : vector<1x16x128xf32> to vector<1x16x128xbf16>
    %32 = vector.extract_strided_slice %29 {offsets = [0, 0, 128], sizes = [1, 16, 128], strides = [1, 1, 1]} : vector<1x16x256xf32> to vector<1x16x128xf32>
    %33 = arith.truncf %32 : vector<1x16x128xf32> to vector<1x16x128xbf16>
    %c0_12 = arith.constant 0 : index
    %c0_13 = arith.constant 0 : index
    %c0_14 = arith.constant 0 : index
    %34 = vector.load %arg10[%c0_12, %c0_13, %c0_14] : memref<1x8x256xbf16, #tpu.memory_space<vmem>>, vector<1x8x256xbf16>
    %35 = vector.extract_strided_slice %34 {offsets = [0, 0, 0], sizes = [1, 8, 128], strides = [1, 1, 1]} : vector<1x8x256xbf16> to vector<1x8x128xbf16>
    %36 = vector.extract_strided_slice %34 {offsets = [0, 0, 128], sizes = [1, 8, 128], strides = [1, 1, 1]} : vector<1x8x256xbf16> to vector<1x8x128xbf16>
    "tpu.trace_start"() <{level = 10 : i32, message = "bkd,bqd->bkq"}> : () -> ()
    %cst_15 = arith.constant dense<0.000000e+00> : vector<1x8x16xf32>
    %37 = tpu.matmul %35, %31, %cst_15 {dimension_numbers = #tpu.dot_dimension_numbers<[2], [2], [1], [1], [0, 0, 0, 1, 1, 1], [0], [0]>} : vector<1x8x128xbf16>, vector<1x16x128xbf16>, vector<1x8x16xf32> -> vector<1x8x16xf32>
    "tpu.trace_stop"() : () -> ()
    %cst_16 = arith.constant dense<0xFF800000> : vector<1x16xf32>
    %38 = vector.multi_reduction <maximumf>, %37, %cst_16 [1] : vector<1x8x16xf32> to vector<1x16xf32>
    %39 = vector.shape_cast %38 : vector<1x16xf32> to vector<1x1x16xf32>
    %40 = vector.broadcast %39 : vector<1x1x16xf32> to vector<1x8x16xf32>
    %41 = arith.subf %37, %40 : vector<1x8x16xf32>
    %42 = math.exp %41 : vector<1x8x16xf32>
    %cst_17 = arith.constant dense<0.000000e+00> : vector<1x16xf32>
    %43 = vector.multi_reduction <add>, %42, %cst_17 [1] : vector<1x8x16xf32> to vector<1x16xf32>
    %44 = vector.shape_cast %43 : vector<1x16xf32> to vector<1x1x16xf32>
    %45 = tpu.reciprocal %44 {approx = true} : vector<1x1x16xf32> -> vector<1x1x16xf32>
    %46 = vector.broadcast %45 : vector<1x1x16xf32> to vector<1x8x16xf32>
    %47 = arith.mulf %42, %46 : vector<1x8x16xf32>
    %48 = arith.truncf %47 : vector<1x8x16xf32> to vector<1x8x16xbf16>
    "tpu.trace_start"() <{level = 10 : i32, message = "bkq,bkd->bqd"}> : () -> ()
    %cst_18 = arith.constant dense<0.000000e+00> : vector<1x16x128xf32>
    %49 = tpu.matmul %48, %36, %cst_18 {dimension_numbers = #tpu.dot_dimension_numbers<[1], [1], [2], [2], [0, 0, 0, 2, 1, 2], [0], [0]>} : vector<1x8x16xbf16>, vector<1x8x128xbf16>, vector<1x16x128xf32> -> vector<1x16x128xf32>
    "tpu.trace_stop"() : () -> ()
    %c0_19 = arith.constant 0 : index
    %c0_20 = arith.constant 0 : index
    %c0_21 = arith.constant 0 : index
    %50 = vector.load %arg8[%c0_19, %c0_20, %c0_21] : memref<1x16x128xf32, #tpu.memory_space<vmem>>, vector<1x16x128xf32>
    tpu.vector_store %arg8[%c0_19, %c0_20, %c0_21], %49 {strides = array<i32>} : memref<1x16x128xf32, #tpu.memory_space<vmem>>, vector<1x16x128xf32>,
    %c0_22 = arith.constant 0 : index
    %c0_23 = arith.constant 0 : index
    %c0_24 = arith.constant 0 : index
    %51 = vector.load %arg9[%c0_22, %c0_23, %c0_24] : memref<1x8x128xf32, #tpu.memory_space<vmem>>, vector<1x8x128xf32>
    "tpu.trace_start"() <{level = 10 : i32, message = "bkq,bqd->bkd"}> : () -> ()
    %cst_25 = arith.constant dense<0.000000e+00> : vector<1x8x128xf32>
    %52 = tpu.matmul %48, %33, %cst_25 {dimension_numbers = #tpu.dot_dimension_numbers<[2], [1], [1], [2], [0, 0, 0, 1, 1, 2], [0], [0]>} : vector<1x8x16xbf16>, vector<1x16x128xbf16>, vector<1x8x128xf32> -> vector<1x8x128xf32>
    "tpu.trace_stop"() : () -> ()
    %53 = arith.addf %51, %52 : vector<1x8x128xf32>
    %c0_26 = arith.constant 0 : index
    %c0_27 = arith.constant 0 : index
    %c0_28 = arith.constant 0 : index
    %54 = vector.load %arg9[%c0_26, %c0_27, %c0_28] : memref<1x8x128xf32, #tpu.memory_space<vmem>>, vector<1x8x128xf32>
    tpu.vector_store %arg9[%c0_26, %c0_27, %c0_28], %53 {strides = array<i32>} : memref<1x8x128xf32, #tpu.memory_space<vmem>>, vector<1x8x128xf32>,
    return
  }
  func.func @transform_0(%arg0: i32, %arg1: i32) -> (i32, i32, i32) {
    %c0_i32 = arith.constant 0 : i32
    %c0_i32_0 = arith.constant 0 : i32
    return %arg0, %arg1, %c0_i32 : i32, i32, i32
  }
  func.func @transform_1(%arg0: i32, %arg1: i32) -> (i32, i32, i32) {
    %c0_i32 = arith.constant 0 : i32
    %c0_i32_0 = arith.constant 0 : i32
    %c0_i32_1 = arith.constant 0 : i32
    return %arg0, %c0_i32, %c0_i32_0 : i32, i32, i32
  }
  func.func @transform_2(%arg0: i32, %arg1: i32) -> (i32, i32) {
    %c0_i32 = arith.constant 0 : i32
    %c0_i32_0 = arith.constant 0 : i32
    %c0_i32_1 = arith.constant 0 : i32
    return %c0_i32, %c0_i32_0 : i32, i32
  }
  func.func @transform_3(%arg0: i32, %arg1: i32) -> (i32, i32) {
    %c0_i32 = arith.constant 0 : i32
    %c0_i32_0 = arith.constant 0 : i32
    %c0_i32_1 = arith.constant 0 : i32
    return %c0_i32, %c0_i32_0 : i32, i32
  }
  func.func @transform_4(%arg0: i32, %arg1: i32) -> (i32, i32) {
    %c0_i32 = arith.constant 0 : i32
    %c0_i32_0 = arith.constant 0 : i32
    %c0_i32_1 = arith.constant 0 : i32
    return %c0_i32, %c0_i32_0 : i32, i32
  }
  func.func @transform_5(%arg0: i32, %arg1: i32) -> (i32, i32) {
    %c0_i32 = arith.constant 0 : i32
    %c0_i32_0 = arith.constant 0 : i32
    %c0_i32_1 = arith.constant 0 : i32
    return %c0_i32, %c0_i32_0 : i32, i32
  }
  func.func @transform_6(%arg0: i32, %arg1: i32) -> (i32, i32, i32) {
    %c0_i32 = arith.constant 0 : i32
    %c0_i32_0 = arith.constant 0 : i32
    return %arg0, %arg1, %c0_i32 : i32, i32, i32
  }
  func.func @transform_7(%arg0: i32, %arg1: i32) -> (i32, i32, i32) {
    %c0_i32 = arith.constant 0 : i32
    %c0_i32_0 = arith.constant 0 : i32
    %c0_i32_1 = arith.constant 0 : i32
    return %arg0, %c0_i32, %c0_i32_0 : i32, i32, i32
  }
}

</mosaic_0001>

<bundles_post_ra>
// kernel: tpu_custom_call.1
= control target key start
LH: loop header
LB: loop body
LE: loop exit
PB: predicated region body
PF: predicated region fallthrough
CT: control target
= control target key end

     0   :  { %s1883_s0 = inlined_call_operand.hbm [shape: f32[2,16,128], index: 0, kind: input, shape index: {}]   ;;  %s1884_s1 = inlined_call_operand.hbm [shape: f32[2,8,128], index: 1, kind: input, shape index: {}]   ;;  %s1885_s2 = inlined_call_operand.hbm [shape: bf16[128,256], index: 2, kind: input, shape index: {}]   ;;  %s1886_s3 = inlined_call_operand.vmem [shape: f32[1,256], index: 3, kind: input, shape index: {}]   ;;  %s1887_s4 = inlined_call_operand.hbm [shape: bf16[128,256], index: 4, kind: input, shape index: {}]   ;;  %s1888_s5 = inlined_call_operand.vmem [shape: f32[1,256], index: 5, kind: input, shape index: {}]   ;;  %s1889_s6 = inlined_call_operand.hbm [shape: f32[2,16,128], index: 6, kind: output, shape index: {0}]   ;;  %s1890_s7 = inlined_call_operand.hbm [shape: f32[2,8,128], index: 7, kind: output, shape index: {1}]  }
   0x1   :  { %1898 = sst [smem:[#allocation25_spill]] %s1885_s2 }
   0x2   :  { %1899 = sst [smem:[#allocation26_spill]] %s1887_s4 }
   0x3   :  { %1900 = sst [smem:[#allocation27_spill]] %s1889_s6 }
   0x4   :  { %13 = vsyncpa [#allocation4], 0 }
   0x5   :  { %15 = vsyncpa [#allocation4 + $0x1], 0 }
   0x6   :  { %16 = vsyncpa [#allocation7], 0 }
   0x7   :  { %18 = vsyncpa [#allocation7 + $0x1], 0 }
   0x8   :  { %19 = vsyncpa [#allocation10], 0 }
   0x9   :  { %20 = vsyncpa [#allocation5], 0 }
   0xa   :  { %22 = vsyncpa [#allocation5 + $0x1], 0 }
   0xb   :  { %23 = vsyncpa [#allocation13], 0 }
   0xc   :  { %25 = vsyncpa [#allocation13 + $0x1], 0  ;;  %s1654_s24 = smov 0   ;;  %s1656_s25 = smov 0  }
   0xd   :  { %s1658_s26 = smov 0   ;;  %s1660_s27 = smov 0  }
   0xe   :  { %s1662_s28 = smov 0   ;;  %s1664_s29 = smov 0  }
   0xf LB: > { %1901 = sst [smem:[#allocation20_spill]] %s1585_s24  ;;  %s1685_s30 = sadd.s32 4294967295, %s1605_s29   ;;  %s1605_s29 = sphi %s1664_s29, %s31_s29   ;;  %s1601_s28 = sphi %s1662_s28, %s1924_s28   ;;  %s1597_s27 = sphi %s1660_s27, %s1923_s27   ;;  %s1593_s26 = sphi %s1658_s26, %s1919_s26   ;;  %s1589_s25 = sphi %s1656_s25, %s1922_s25   ;;  %s1585_s24 = sphi %s1654_s24, %s1921_s24  }
  0x10   : > { %1902 = sst [smem:[#allocation21_spill]] %s1593_s26  ;;  %s1059_s8 = sadd.s32 4294967294, %s1605_s29  }
  0x11   : > { %p65_p0 = scmp.ne.s32.totalorder %s1589_s25, %s1585_s24  ;;  %p66_p1 = scmp.eq.s32.totalorder %s1685_s30, 0 }
  0x12   : > { %p201_p2 = scmp.eq.s32.totalorder %s1685_s30, 1  ;;  %p207_p3 = scmp.eq.s32.totalorder %s1059_s8, 1 }
  0x13   : > { %p1694_p4 = por %p66_p1, %p65_p0  ;;  %p1060_p5 = scmp.ge.s32.totalorder %s1605_s29, 1 }
  0x14   : > { %p1699_p6 = por %p207_p3, %p65_p0  ;;  %p240_p7 = scmp.lt.s32.totalorder %s1605_s29, 3 }
  0x15   : > { %s1906_s2 = sld [smem:[#allocation25_spill]]  ;;  %s1607_s15 = smov [#allocation8]  }
  0x16   : > { %s1904_s10 = scalar_select %p1699_p6, 1, 0 }
  0x17   : > { %p1707_p8 = pnand %p1060_p5, %p240_p7  ;;  %s253_s16 = sshll.u32 %s1607_s15, 4  ;;  %s254_s16 = int_to_ptr.vmem [resolvable:$true] %s253_s16 }
  0x18   : > { %1905 = sst [smem:[#allocation22_spill]] %s1904_s10  ;;  %p1063_p11 = scmp.ge.s32.totalorder %s1605_s29, 2 }
  0x19   : > { %p1263_p9 = pneg %p1707_p8  ;;  %s1908_s4 = sld [smem:[#allocation26_spill]] }
  0x1a   : > { %s1891_s20 = smov 128   ;;  %s1892_s21 = smov 8  }
  0x1b   : > { %s251_s13 = sshll.u32 %s1906_s2, 4  ;;  %p1264_p10 = pnand %p1263_p9, %p66_p1  ;;  %s252_s13 = int_to_ptr.hbm [resolvable:$true] %s251_s13 }
  0x1c   : > { %s1610_s22 = smov [#allocation9]   ;;  %s43_s8 = sadd.s32 1, %s1601_s28 }
  0x1d   : > { %1266 = dma.hbm_to_vmem [thread:$0]  (!%p1264_p10), %s252_s13, 2048, %s254_s16, [#allocation7], %s1891_s20, %s1891_s20, %s1892_s21  }
  0x1e   : > { %s270_s23 = sshll.u32 %s1610_s22, 4  ;;  %s52_s11 = sadd.s32 1, %s1593_s26  ;;  %s271_s23 = int_to_ptr.vmem [resolvable:$true] %s270_s23 }
  0x1f   : > { %s268_s19 = sshll.u32 %s1908_s4, 4  ;;  %p45_p12 = scmp.ge.s32.totalorder %s43_s8, 2  ;;  %s269_s19 = int_to_ptr.hbm [resolvable:$true] %s268_s19 }
  0x20   : > { %1269 = dma.hbm_to_vmem [thread:$0]  (!%p1264_p10), %s269_s19, 2048, %s271_s23, [#allocation10], %s1891_s20, %s1891_s20, %s1892_s21  }
  0x21   : > { %p59_p13 = scmp.ne.s32.totalorder %s1593_s26, %s1589_s25  ;;  %p60_p0 = scmp.eq.s32.totalorder %s1605_s29, 0 }
  0x22   : > { %p1286_p3 = scmp.lt.s32.totalorder %s1605_s29, 2  ;;  %s1926_s8 = smov (%p45_p12, %s43_s8), 0 }
  0x23   : > { %1909 = sst [smem:[#allocation23_spill]] %s1926_s8  ;;  %p1733_p5 = por %p60_p0, %p59_p13 }
  0x24   : > { %p1739_p7 = por %p201_p2, %p59_p13  ;;  %s47_s15 = ssub.s32 %s1601_s28, %s1926_s8 }
  0x25   : > { %s287_s16 = sand.u32 1, %s1593_s26   ;;  %p50_p9 = scmp.eq.s32.totalorder %s47_s15, 0 }
  0x26   : > { %s1064_s17 = sshll.u32 %s287_s16, 4  ;;  %s1213_s18 = sshll.u32 %s1601_s28, 4 }
  0x27   : > { %s1748_s19 = scalar_select %p50_p9, %s1593_s26, %s52_s11  }
  0x28   : > { %s298_s20 = scalar_lea.hbm %s1883_s0, %s1213_s18  ;;  %s291_s2 = scalar_lea.vmem [#allocation3], %s1064_s17 }
  0x29   : > { %1912 = sst [smem:[#allocation24_spill]] %s1748_s19  ;;  %s299_s21 = sshll.u32 %s298_s20, 4  ;;  %s300_s21 = int_to_ptr.hbm [resolvable:$true] %s299_s21 }
  0x2a   : > { %s301_s4 = sshll.u32 %s291_s2, 4  ;;  %p1271_p2 = pnand %p1286_p3, %p1733_p5  ;;  %s302_s4 = int_to_ptr.vmem [resolvable:$true] %s301_s4 }
  0x2b   : > { %s311_s8 = sand.u32 1, %s1605_s29   ;;  %s1067_s10 = sshll.u32 %s287_s16, 3 }
  0x2c   : > { %s288_s24 = scalar_lea.sflag [#allocation4], %s287_s16  ;;  %s1913_s15 = smov 8  }
  0x2d   : > { %s1914_s6 = smov 128   ;;  %s1068_s11 = sshll.u32 %s1601_s28, 3 }
  0x2e   : > { %1273 = dma.hbm_to_vmem [thread:$0]  (!%p1271_p2), %s300_s21, 256, %s302_s4, %s288_s24, %s1914_s6, %s1914_s6, %s1913_s15  }
  0x2f   : > { %s315_s19 = scalar_lea.vmem [#allocation6], %s1067_s10  ;;  %s319_s20 = scalar_lea.hbm %s1884_s1, %s1068_s11 }
  0x30   : > { %s323_s26 = sshll.u32 %s315_s19, 4  ;;  %s321_s2 = sshll.u32 %s319_s20, 4  ;;  %s324_s26 = int_to_ptr.vmem [resolvable:$true] %s323_s26  ;;  %s322_s2 = int_to_ptr.hbm [resolvable:$true] %s321_s2 }
  0x31   : > { %s312_s12 = scalar_lea.sflag [#allocation7], %s311_s8  ;;  %332 = sbr.rel (%p1707_p8) target bundleno = 975 (0x3cf), region = 44 }
  0x32   : > { %1276 = dma.hbm_to_vmem [thread:$0]  (!%p1271_p2), %s322_s2, 128, %s324_s26, %s312_s12  }
  0x33   : > { %s1768_s16 = sand.u32 (!%p1707_p8), 1, %s1589_s25  }
  0x34   : > { %s1070_s4 = sshll.u32 (!%p1707_p8), %s1768_s16, 4  ;;  %s335_s6 = scalar_lea.sflag (!%p1707_p8), [#allocation4], %s1768_s16 }
  0x35   : > { %s338_s24 = scalar_lea.vmem (!%p1707_p8), [#allocation3], %s1070_s4 }
  0x36   : > { %1560 = dma.done.wait (%p1694_p4), %s335_s6, 256  }
  0x37   : > { %1562 = vsyncadd (%p1694_p4), %s335_s6, 4294967040  ;;  %s344_s26 = sand.u32 1, %s1685_s30   ;;  %s1071_s10 = sshll.u32 %s1768_s16, 3 }
  0x38   : > { %s345_s14 = scalar_lea.sflag [#allocation7], %s344_s26  ;;  %s348_s21 = scalar_lea.vmem [#allocation6], %s1071_s10 }
  0x39   : > { %1564 = dma.done.wait (%p1694_p4), %s345_s14, 128  }
  0x3a   : > { %1566 = vsyncadd (%p1694_p4), %s345_s14, 4294967168 }
  0x3b   : > { %1568 = dma.done.wait (%p66_p1), [#allocation7], 2048  }
  0x3c   : > { %1570 = vsyncadd (%p66_p1), [#allocation7], 4294965248 }
  0x3d   : > { %1572 = dma.done.wait (%p66_p1), [#allocation10], 2048  }
  0x3e   : > { %1574 = vsyncadd (%p66_p1), [#allocation10], 4294965248  ;;  %v567_v0 = vld [vmem:[%s338_s24] sm:$0xff]  ;;  %v568_v2 = vld [vmem:[%s338_s24 + $0x8] sm:$0xff]  ;;  %v1611_v3 = vmov 128.0   ;;  %vm814_vm10 = vcmask 1043456  }
  0x3f   : > { %v407_v1 = vld [vmem:[%s348_s21] sm:$0xff]  ;;  %569 = vadd.xlane.f32.xlu0 %v567_v0  ;;  %1347 = vrcp.f32 %v1611_v3  ;;  %v1190_v28 = vld [vmem:[#allocation8 + $0x60] sm:$0xf]  ;;  %v1243_v29 = vld [vmem:[#allocation8 + $0x64] sm:$0xf0]  ;;  %vm771_vm11 = vcmask 130048  }
  0x40   : > { %408 = vadd.xlane.f32.xlu1 %v407_v1  ;;  %v1198_v22 = vld [vmem:[#allocation8 + $0x70] sm:$0xf]  ;;  %v1245_v23 = vld [vmem:[#allocation8 + $0x74] sm:$0xf0]  ;;  %v1244_v24 = vld [vmem:[#allocation8 + $0x74] sm:$0xf]  ;;  %v1191_v31 = vor.u32 %v1243_v29, %v1190_v28 }
  0x41   : > { %v1199_v25 = vor.u32 %v1245_v23, %v1198_v22  ;;  %v1200_v26 = vld [vmem:[#allocation8 + $0x78] sm:$0xf0]  ;;  %v1242_v30 = vld [vmem:[#allocation8 + $0x64] sm:$0xf]  ;;  %v1192_v32 = vld [vmem:[#allocation8 + $0x68] sm:$0xf0] }
  0x42   : > { %v1203_v27 = vor.u32 %v1244_v24, %v1200_v26  ;;  %v1195_v33 = vor.u32 %v1242_v30, %v1192_v32  ;;  %v1134_v34 = vld [vmem:[#allocation9 + $0x70] sm:$0xf]  ;;  %v1229_v35 = vld [vmem:[#allocation9 + $0x74] sm:$0xf0]  ;;  %v1228_v36 = vld [vmem:[#allocation9 + $0x74] sm:$0xf] }
  0x43   : > { %719 = vmatpush.bf16.msra.mxu2 %v1199_v25  ;;  %v1135_v37 = vor.u32 %v1229_v35, %v1134_v34  ;;  %v1136_v38 = vld [vmem:[#allocation9 + $0x78] sm:$0xf0]  ;;  %v1182_v39 = vld [vmem:[#allocation8 + $0x50] sm:$0xf]  ;;  %v1241_v40 = vld [vmem:[#allocation8 + $0x54] sm:$0xf0] }
  0x44   : > { %733 = vmatpush.bf16.msra.mxu3 %v1203_v27  ;;  %v1139_v41 = vor.u32 %v1228_v36, %v1136_v38  ;;  %v1183_v42 = vor.u32 %v1241_v40, %v1182_v39  ;;  %v1240_v43 = vld [vmem:[#allocation8 + $0x54] sm:$0xf]  ;;  %v1184_v44 = vld [vmem:[#allocation8 + $0x58] sm:$0xf0]  ;;  %v1126_v46 = vld [vmem:[#allocation9 + $0x60] sm:$0xf] }
  0x45   : > { %v1348_v4 = vpop.eup %1347  ;;  %538 = vmatpush.bf16.msra.mxu0 %v1135_v37  ;;  %v1187_v45 = vor.u32 %v1240_v43, %v1184_v44  ;;  %v1227_v47 = vld [vmem:[#allocation9 + $0x64] sm:$0xf0]  ;;  %v1226_v48 = vld [vmem:[#allocation9 + $0x64] sm:$0xf]  ;;  %v1128_v50 = vld [vmem:[#allocation9 + $0x68] sm:$0xf0] }
  0x46   : > { %v411_v5 = vmul.f32 128.0, %v1348_v4  ;;  %vm415_vm0 = vweird.f32 %v1348_v4  ;;  %551 = vmatpush.bf16.msra.mxu1 %v1139_v41  ;;  %v1127_v49 = vor.u32 %v1227_v47, %v1126_v46  ;;  %v1174_v51 = vld [vmem:[#allocation8 + $0x40] sm:$0xf]  ;;  %v1239_v52 = vld [vmem:[#allocation8 + $0x44] sm:$0xf0]  ;;  %v1131_v53 = vor.u32 %v1226_v48, %v1128_v50  ;;  %s399_s19 = scalar_lea.vmem [#allocation12], %s1071_s10 }
  0x47   : > { %571 = vadd.xlane.f32.xlu0 %v568_v2  ;;  %720 = vmatpush.bf16.msra.mxu2 %v1191_v31  ;;  %v1175_v54 = vor.u32 %v1239_v52, %v1174_v51  ;;  %v1238_v55 = vld [vmem:[#allocation8 + $0x44] sm:$0xf]  ;;  %v1176_v56 = vld [vmem:[#allocation8 + $0x48] sm:$0xf0]  ;;  %v1118_v58 = vld [vmem:[#allocation9 + $0x50] sm:$0xf] }
  0x48   : > { %v412_v6 = vsub.f32 1.0, %v411_v5  ;;  %734 = vmatpush.bf16.msra.mxu3 %v1195_v33  ;;  %v1179_v57 = vor.u32 %v1238_v55, %v1176_v56  ;;  %v1225_v59 = vld [vmem:[#allocation9 + $0x54] sm:$0xf0]  ;;  %v1224_v60 = vld [vmem:[#allocation9 + $0x54] sm:$0xf]  ;;  %vm810_vm12 = vcmask 64512  }
  0x49   : > { %539 = vmatpush.bf16.msra.mxu0 %v1127_v49  ;;  %v1119_v61 = vor.u32 %v1225_v59, %v1118_v58  ;;  %v1120_v62 = vld [vmem:[#allocation9 + $0x58] sm:$0xf0]  ;;  %v1166_v63 = vld [vmem:[#allocation8 + $0x30] sm:$0xf]  ;;  %v1236_v3 = vld [vmem:[#allocation8 + $0x34] sm:$0xf] }
  0x4a   : > { %v413_v7 = vmul.f32 %v1348_v4, %v412_v6  ;;  %552 = vmatpush.bf16.msra.mxu1 %v1131_v53  ;;  %v1110_v6 = vld [vmem:[#allocation9 + $0x40] sm:$0xf]  ;;  %v1102_v22 = vld [vmem:[#allocation9 + $0x30] sm:$0xf]  ;;  %v1221_v23 = vld [vmem:[#allocation9 + $0x34] sm:$0xf0] }
  0x4b   : > { %721 = vmatpush.bf16.msra.mxu2 %v1183_v42  ;;  %v1220_v24 = vld [vmem:[#allocation9 + $0x34] sm:$0xf]  ;;  %v1103_v25 = vor.u32 %v1221_v23, %v1102_v22  ;;  %v1104_v26 = vld [vmem:[#allocation9 + $0x38] sm:$0xf0]  ;;  %v1150_v27 = vld [vmem:[#allocation8 + $0x10] sm:$0xf] }
  0x4c   : > { %v414_v8 = vadd.f32 %v1348_v4, %v413_v7  ;;  %735 = vmatpush.bf16.msra.mxu3 %v1187_v45  ;;  %v1223_v7 = vld [vmem:[#allocation9 + $0x44] sm:$0xf0]  ;;  %v1233_v28 = vld [vmem:[#allocation8 + $0x14] sm:$0xf0]  ;;  %v1107_v29 = vor.u32 %v1220_v24, %v1104_v26  ;;  %v1232_v31 = vld [vmem:[#allocation8 + $0x14] sm:$0xf] }
  0x4d   : > { %540 = vmatpush.bf16.msra.mxu0 %v1119_v61  ;;  %v1151_v30 = vor.u32 %v1233_v28, %v1150_v27  ;;  %v1152_v32 = vld [vmem:[#allocation8 + $0x18] sm:$0xf0]  ;;  %v1094_v34 = vld [vmem:[#allocation9 + $0x20] sm:$0xf]  ;;  %v1219_v35 = vld [vmem:[#allocation9 + $0x24] sm:$0xf0] }
  0x4e   : > { %v1794_v9 = vsel %vm415_vm0, %v1348_v4, %v414_v8  ;;  %v1168_v4 = vld [vmem:[#allocation8 + $0x38] sm:$0xf0]  ;;  %v1222_v8 = vld [vmem:[#allocation9 + $0x44] sm:$0xf]  ;;  %v1155_v33 = vor.u32 %v1232_v31, %v1152_v32  ;;  %v1095_v37 = vor.u32 %v1219_v35, %v1094_v34  ;;  %v1096_v38 = vld [vmem:[#allocation9 + $0x28] sm:$0xf0] }
  0x4f   : > { %722 = vmatpush.bf16.msra.mxu2 %v1175_v54  ;;  %v1171_v5 = vor.u32 %v1236_v3, %v1168_v4  ;;  %v1218_v36 = vld [vmem:[#allocation9 + $0x24] sm:$0xf]  ;;  %v1142_v39 = vld [vmem:[#allocation8] sm:$0xf]  ;;  %v1231_v40 = vld [vmem:[#allocation8 + $0x4] sm:$0xf0] }
  0x50   : > { %736 = vmatpush.bf16.msra.mxu3 %v1179_v57  ;;  %v1099_v41 = vor.u32 %v1218_v36, %v1096_v38  ;;  %v1143_v42 = vor.u32 %v1231_v40, %v1142_v39  ;;  %v1230_v43 = vld [vmem:[#allocation8 + $0x4] sm:$0xf]  ;;  %v1144_v44 = vld [vmem:[#allocation8 + $0x8] sm:$0xf0]  ;;  %v1086_v48 = vld [vmem:[#allocation9 + $0x10] sm:$0xf] }
  0x51   : > { %v1147_v46 = vor.u32 %v1230_v43, %v1144_v44  ;;  %v1217_v49 = vld [vmem:[#allocation9 + $0x14] sm:$0xf0]  ;;  %v1216_v50 = vld [vmem:[#allocation9 + $0x14] sm:$0xf]  ;;  %v1088_v52 = vld [vmem:[#allocation9 + $0x18] sm:$0xf0] }
  0x52   : > { %v1087_v51 = vor.u32 %v1217_v49, %v1086_v48  ;;  %v1091_v54 = vor.u32 %v1216_v50, %v1088_v52  ;;  %v1078_v55 = vld [vmem:[#allocation9] sm:$0xf]  ;;  %v1215_v56 = vld [vmem:[#allocation9 + $0x4] sm:$0xf0]  ;;  %v1214_v58 = vld [vmem:[#allocation9 + $0x4] sm:$0xf] }
  0x53   : > { %v1079_v57 = vor.u32 %v1215_v56, %v1078_v55  ;;  %v1080_v59 = vld [vmem:[#allocation9 + $0x8] sm:$0xf0]  ;;  %s1210_s23 = sshll.u32 %s1597_s27, 3  ;;  %s896_s15 = sshll.u32 %s399_s19, 4  ;;  %s897_s15 = int_to_ptr.vmem [resolvable:$true] %s896_s15 }
  0x54   : > { %737 = vmatpush.bf16.msra.mxu3 %v1171_v5  ;;  %s894_s18 = scalar_lea.hbm %s1890_s7, %s1210_s23  ;;  %s865_s2 = scalar_lea.sflag [#allocation13], %s1768_s16 }
  0x55   : > { %s898_s20 = sshll.u32 %s894_s18, 4  ;;  %s1499_s10 = scalar_lea.hbm %s1890_s7, 16  ;;  %s899_s20 = int_to_ptr.hbm [resolvable:$true] %s898_s20 }
  0x56   : > { %s1493_s12 = sshra.s32 %s899_s20, 4  ;;  %s1494_s12 = int_to_ptr.hbm [resolvable:$true] %s1493_s12 }
  0x57   : > { %s1495_s6 = scalar_lea.hbm %s1494_s12, 8  ;;  %p1500_p10 = scmp.lt.s32.totalorder %s1494_s12, %s1890_s7 }
  0x58   : > { %p1496_p1 = scmp.ne.s32.totalorder %s1494_s12, %s1495_s6  ;;  %p1501_p12 = scmp.lt.s32.totalorder %s1499_s10, %s1495_s6 }
  0x5a   : > { %p1497_p4 = pnand %p1496_p1, %p1739_p7  ;;  %p1502_p13 = por %p1501_p12, %p1500_p10 }
  0x5c   : > { %p1498_p8 = pneg %p1497_p4 }
  0x5e   : > { %p1503_p0 = pnand %p1502_p13, %p1498_p8 }
  0xb2   : > { %v570_v10 = vpop.xlane.xlu0 %569 }
  0xb3   : > { %v580_v11 = vmul.f32 %v570_v10, %v1794_v9  ;;  %v409_v15 = vpop.xlane.xlu1 %408  ;;  %v1111_v10 = vor.u32 %v1223_v7, %v1110_v6 }
  0xb4   : > { %v417_v18 = vmul.f32 %v1794_v9, %v409_v15 }
  0xb5   : > { %v1797_v12 = vsub.f32 %v567_v0, %v580_v11  ;;  %v1237_v0 = vld [vmem:[#allocation8 + $0x34] sm:$0xf0]  ;;  %v1112_v11 = vld [vmem:[#allocation9 + $0x48] sm:$0xf0]  ;;  %541 = vmatpush.bf16.msra.mxu0 %v1111_v10 }
  0xb6   : > { %v1807_v20 = vsub.f32 %v407_v1, %v417_v18  ;;  %v1123_v1 = vor.u32 %v1224_v60, %v1120_v62  ;;  %v1115_v15 = vor.u32 %v1222_v8, %v1112_v11  ;;  %v1234_v18 = vld [vmem:[#allocation8 + $0x24] sm:$0xf]  ;;  %v1083_v60 = vor.u32 %v1214_v58, %v1080_v59 }
  0xb7   : > { %v584_v13 = vmul.f32 %v1797_v12, %v1797_v12 }
  0xb8   : > { %v419_v21 = vmul.f32 %v1807_v20, %v1807_v20  ;;  %553 = vmatpush.bf16.msra.mxu1 %v1123_v1 }
  0xb9   : > { %586 = vadd.xlane.f32.xlu1 %v584_v13  ;;  %v1158_v13 = vld [vmem:[#allocation8 + $0x20] sm:$0xf]  ;;  %542 = vmatpush.bf16.msra.mxu0 %v1103_v25 }
  0xba   : > { %v572_v14 = vpop.xlane.xlu0 %571 }
  0xbb   : > { %v581_v16 = vmul.f32 %v572_v14, %v1794_v9  ;;  %v1235_v14 = vld [vmem:[#allocation8 + $0x24] sm:$0xf0] }
  0xbc   : > { %554 = vmatpush.bf16.msra.mxu1 %v1115_v15 }
  0xbd   : > { %v1802_v17 = vsub.f32 %v568_v2, %v581_v16  ;;  %v1167_v2 = vor.u32 %v1237_v0, %v1166_v63  ;;  %v1159_v16 = vor.u32 %v1235_v14, %v1158_v13  ;;  %543 = vmatpush.bf16.msra.mxu0 %v1095_v37 }
  0xbf   : > { %v585_v19 = vmul.f32 %v1802_v17, %v1802_v17  ;;  %723 = vmatpush.bf16.msra.mxu2 %v1167_v2 }
  0xc0   : > { %555 = vmatpush.bf16.msra.mxu1 %v1107_v29 }
  0xc1   : > { %588 = vadd.xlane.f32.xlu2 %v585_v19  ;;  %v1160_v19 = vld [vmem:[#allocation8 + $0x28] sm:$0xf0]  ;;  %544 = vmatpush.bf16.msra.mxu0 %v1087_v51 }
  0xc3   : > { %724 = vmatpush.bf16.msra.mxu2 %v1159_v16 }
  0xc4   : > { %556 = vmatpush.bf16.msra.mxu1 %v1099_v41 }
  0xc5   : > { %545 = vmatpush.bf16.msra.mxu0 %v1079_v57 }
  0xc7   : > { %725 = vmatpush.bf16.msra.mxu2 %v1151_v30 }
  0xc8   : > { %557 = vmatpush.bf16.msra.mxu1 %v1091_v54 }
  0xc9   : > { %420 = vadd.xlane.f32.xlu2 %v419_v21  ;;  %v1163_v21 = vor.u32 %v1234_v18, %v1160_v19 }
  0xcb   : > { %738 = vmatpush.bf16.msra.mxu3 %v1163_v21  ;;  %726 = vmatpush.bf16.msra.mxu2 %v1143_v42 }
  0xcc   : > { %558 = vmatpush.bf16.msra.mxu1 %v1083_v60 }
  0xcf   : > { %739 = vmatpush.bf16.msra.mxu3 %v1155_v33 }
  0xd3   : > { %740 = vmatpush.bf16.msra.mxu3 %v1147_v46 }
 0x12c   : > { %v587_v45 = vpop.xlane.xlu1 %586 }
 0x12d   : > { %v590_v47 = vmul.f32 %v587_v45, %v1794_v9 }
 0x12f   : > { %v592_v53 = vadd.f32 1e-05, %v590_v47 }
 0x131   : > { %1349 = vrsqrt.f32 %v592_v53  ;;  %vm600_vm2 = vweird.f32 %v592_v53 }
 0x134   : > { %v589_v61 = vpop.xlane.xlu2 %588 }
 0x135   : > { %v591_v62 = vmul.f32 %v589_v61, %v1794_v9 }
 0x137   : > { %v1350_v63 = vpop.eup %1349  ;;  %v593_v0 = vadd.f32 1e-05, %v591_v62 }
 0x138   : > { %v595_v1 = vmul.f32 %v1350_v63, %v592_v53  ;;  %vm601_vm1 = vweird.f32 %v1350_v63 }
 0x139   : > { %1351 = vrsqrt.f32 %v593_v0  ;;  %vm602_vm4 = vmor %vm600_vm2, %vm601_vm1  ;;  %vm610_vm5 = vweird.f32 %v593_v0 }
 0x13a   : > { %v596_v2 = vmul.f32 %v1350_v63, %v595_v1 }
 0x13c   : > { %v597_v3 = vmul.f32 0.5, %v596_v2  ;;  %v421_v4 = vpop.xlane.xlu2 %420 }
 0x13d   : > { %v422_v5 = vmul.f32 %v421_v4, %v1794_v9 }
 0x13e   : > { %v598_v8 = vsub.f32 1.5, %v597_v3 }
 0x13f   : > { %v1352_v6 = vpop.eup %1351  ;;  %v423_v7 = vadd.f32 1e-05, %v422_v5 }
 0x140   : > { %v605_v10 = vmul.f32 %v1352_v6, %v593_v0  ;;  %v599_v14 = vmul.f32 %v1350_v63, %v598_v8  ;;  %vm611_vm3 = vweird.f32 %v1352_v6 }
 0x141   : > { %1353 = vrsqrt.f32 %v423_v7  ;;  %vm612_vm6 = vmor %vm610_vm5, %vm611_vm3  ;;  %vm430_vm7 = vweird.f32 %v423_v7 }
 0x142   : > { %v606_v11 = vmul.f32 %v1352_v6, %v605_v10  ;;  %v603_v19 = vsel %vm602_vm4, %v1350_v63, %v599_v14 }
 0x143   : > { %v614_v23 = vmul.f32 %v603_v19, %v1797_v12  ;;  %v452_v12 = vld [vmem:[%s1888_s5] sm:$0x3] }
 0x144   : > { %v607_v13 = vmul.f32 0.5, %v606_v11  ;;  %v454_v32 = vperm.slane %v452_v12, 0  ;;  %v455_v33 = vperm.slane %v452_v12, 1 }
 0x146   : > { %v608_v15 = vsub.f32 1.5, %v607_v13 }
 0x147   : > { %v1354_v16 = vpop.eup %1353 }
 0x148   : > { %v425_v18 = vmul.f32 %v1354_v16, %v423_v7  ;;  %v609_v21 = vmul.f32 %v1352_v6, %v608_v15  ;;  %vm431_vm8 = vweird.f32 %v1354_v16 }
 0x149   : > { %vm432_vm9 = vmor %vm430_vm7, %vm431_vm8 }
 0x14a   : > { %v426_v9 = vmul.f32 %v1354_v16, %v425_v18  ;;  %v613_v22 = vsel %vm612_vm6, %v1352_v6, %v609_v21 }
 0x14b   : > { %v615_v24 = vmul.f32 %v613_v22, %v1802_v17  ;;  %v633_v17 = vld [vmem:[%s1886_s3] sm:$0x3] }
 0x14c   : > { %v427_v25 = vmul.f32 0.5, %v426_v9  ;;  %v635_v34 = vperm.slane %v633_v17, 0  ;;  %v636_v37 = vperm.slane %v633_v17, 1 }
 0x14d   : > { %v616_v26 = vpack.c.bf16 %v615_v24, %v614_v23 }
 0x14e   : > { %v428_v27 = vsub.f32 1.5, %v427_v25 }
 0x14f   : > { %727 = vmatmul.bf16.vlgmr.msra.gmra.mxu2 %v616_v26  ;;  %741 = vmatmul.bf16.vlgmr.msra.gmra.mxu3 %v616_v26 }
 0x150   : > { %v429_v28 = vmul.f32 %v1354_v16, %v428_v27 }
 0x152   : > { %v433_v29 = vsel %vm432_vm9, %v1354_v16, %v429_v28 }
 0x153   : > { %v434_v30 = vmul.f32 %v433_v29, %v1807_v20 }
 0x155   : > { %v435_v31 = vpack.c.bf16 %v434_v30, %v434_v30 }
 0x157   : > { %546 = vmatmul.bf16.vlgmr.msra.gmra.mxu0 %v435_v31  ;;  %559 = vmatmul.bf16.vlgmr.msra.gmra.mxu1 %v435_v31 }
 0x1d2   : > { %v728_v35 = vpop.f32.mrf.mxu2  ;;  %v742_v36 = vpop.f32.mrf.mxu3 }
 0x1d3   : > { %v729_v41 = vadd.f32 %v728_v35, %v635_v34  ;;  %v743_v42 = vadd.f32 %v742_v36, %v636_v37 }
 0x1d4   : > { %v547_v38 = vpop.f32.mrf.mxu0  ;;  %v560_v39 = vpop.f32.mrf.mxu1 }
 0x1d5   : > { %v548_v20 = vadd.f32 %v547_v38, %v454_v32  ;;  %v561_v40 = vadd.f32 %v560_v39, %v455_v33  ;;  %v747_v45 = vpack.c.bf16 %v729_v41, %v729_v41  ;;  %v749_v48 = vpack.c.bf16 %v743_v42, %v743_v42 }
 0x1d7   : > { %v564_v43 = vpack.c.bf16 %v561_v40, %v548_v20  ;;  %v754_v56 = vunpack.c.l.b16 %v747_v45  ;;  %v837_v57 = vunpack.c.l.b16 %v749_v48 }
 0x1d9   : > { %v793_v44 = vrot.slane %v564_v43, 4 }
 0x1da   : > { %v730_v46 = vpop.f32.mrf.mxu2  ;;  %v744_v47 = vpop.f32.mrf.mxu3 }
 0x1db   : > { %v731_v49 = vadd.f32 %v730_v46, %v635_v34  ;;  %v745_v50 = vadd.f32 %v744_v47, %v636_v37  ;;  %v816_v51 = vsel %vm814_vm10, %v793_v44, 0 }
 0x1dc   : > { %v549_v52 = vpop.f32.mrf.mxu0  ;;  %v562_v53 = vpop.f32.mrf.mxu1  ;;  %825 = vmatpush.bf16.msrb.mxu1 %v816_v51 }
 0x1dd   : > { %v748_v54 = vpack.c.bf16 %v731_v49, %v731_v49  ;;  %v750_v55 = vpack.c.bf16 %v745_v50, %v745_v50 }
 0x1df   : > { %v755_v58 = vunpack.c.l.b16 %v748_v54  ;;  %v838_v59 = vunpack.c.l.b16 %v750_v55 }
 0x1e1   : > { %v756_v60 = vpack.c.b16 %v755_v58, %v754_v56  ;;  %v839_v61 = vpack.c.b16 %v838_v59, %v837_v57 }
 0x1e3   : > { %765 = vmatpush.bf16.xpose.msrb.mxu0 %v756_v60  ;;  %851 = vmatpush.bf16.msrb.mxu2 %v839_v61 }
 0x1ea   : > { %766 = vmatmul.bf16.vlgmr.msrb.gmra.mxu0 %v564_v43 }
 0x267   : > { %v767_v62 = vpop.f32.mrf.mxu0 }
 0x268   : > { %v772_v63 = vsel %vm771_vm11, %v767_v62, -inf }
 0x269   : > { %v773_v0 = vrot.slane %v772_v63, 4 }
 0x26b   : > { %v774_v1 = vmax.f32 %v772_v63, %v773_v0 }
 0x26d   : > { %v775_v2 = vrot.slane %v774_v1, 2 }
 0x26f   : > { %v776_v3 = vmax.f32 %v774_v1, %v775_v2  ;;  %v769_v4 = vpop.f32.mrf.mxu0 }
 0x271   : > { %v777_v5 = vrot.slane %v776_v3, 1 }
 0x273   : > { %v778_v6 = vmax.f32 %v776_v3, %v777_v5 }
 0x275   : > { %v779_v7 = vsub.f32 %v767_v62, %v778_v6 }
 0x277   : > { %v780_v8 = vmul.f32 1.442695, %v779_v7 }
 0x279   : > { %1355 = vpow2.f32 %v780_v8 }
 0x27f   : > { %v1356_v10 = vpop.eup %1355 }
 0x280   : > { %v782_v11 = vsel %vm771_vm11, %v1356_v10, 0.0 }
 0x281   : > { %v783_v13 = vrot.slane %v782_v11, 4 }
 0x283   : > { %v784_v14 = vadd.f32 %v783_v13, %v782_v11 }
 0x285   : > { %v785_v15 = vrot.slane %v784_v14, 2 }
 0x287   : > { %v786_v16 = vadd.f32 %v785_v15, %v784_v14 }
 0x289   : > { %v787_v18 = vrot.slane %v786_v16, 1 }
 0x28b   : > { %v788_v19 = vadd.f32 %v787_v18, %v786_v16 }
 0x28d   : > { %1357 = vrcp.f32 %v788_v19 }
 0x293   : > { %v1358_v21 = vpop.eup %1357 }
 0x294   : > { %v790_v9 = vmul.f32 %v1358_v21, %v1356_v10 }
 0x296   : > { %v791_v22 = vpack.c.bf16 %v790_v9, %v790_v9 }
 0x298   : > { %794 = vxpose.xlu0.c.b16.start.end [1/1] (short) (narrow) %v791_v22, 16  ;;  %1205 = vmatmul.msk.bf16.vlgmr.msrb.gmra.mxu2 %vm771_vm11, %v791_v22 }
 0x31b   : > { %v853_v23 = vpop.f32.mrf.mxu2 }
 0x31c   : > { %858 = vst [vmem:[%s399_s19] sm:$0xff] %v853_v23 }
 0x323   : > { %v855_v24 = vpop.f32.mrf.mxu2 }
 0x344   : > { %v802_v25 = vpop.trf.xlu0 }
 0x345   : > { %1204 = vmatmul.msk.bf16.vlgmr.msrb.gmra.mxu1 %vm810_vm12, %v802_v25 }
 0x346   : > { %1506 = shalt.err (!%p1503_p0)
}
 0x347   : > { %1260 = dma.vmem_to_hbm [thread:$0]  (%p1739_p7), %s897_s15, 128, %s899_s20, %s865_s2  }
 0x348   : > { %s1246_s30 = sshll.u32 %s1597_s27, 4  ;;  %s1915_s17 = sld [smem:[#allocation27_spill]] }
 0x349   : > { %s392_s23 = scalar_lea.vmem [#allocation11], %s1070_s4  ;;  %s860_s18 = scalar_lea.sflag [#allocation5], %s1768_s16 }
 0x34a   : > { %s879_s11 = sshll.u32 %s392_s23, 4  ;;  %s880_s11 = int_to_ptr.vmem [resolvable:$true] %s879_s11 }
 0x34e   : > { %s878_s19 = scalar_lea.hbm %s1915_s17, %s1246_s30  ;;  %s1527_s2 = scalar_lea.hbm %s1915_s17, 32 }
 0x34f   : > { %s881_s22 = sshll.u32 %s878_s19, 4  ;;  %s882_s22 = int_to_ptr.hbm [resolvable:$true] %s881_s22 }
 0x350   : > { %s1521_s12 = sshra.s32 %s882_s22, 4  ;;  %s1522_s12 = int_to_ptr.hbm [resolvable:$true] %s1521_s12 }
 0x351   : > { %s1523_s15 = scalar_lea.hbm %s1522_s12, 16  ;;  %p1528_p2 = scmp.lt.s32.totalorder %s1522_s12, %s1915_s17 }
 0x352   : > { %p1524_p3 = scmp.ne.s32.totalorder %s1522_s12, %s1523_s15  ;;  %p1529_p1 = scmp.lt.s32.totalorder %s1527_s2, %s1523_s15 }
 0x354   : > { %p1525_p5 = pnand %p1524_p3, %p1739_p7  ;;  %p1530_p4 = por %p1529_p1, %p1528_p2 }
 0x356   : > { %p1526_p9 = pneg %p1525_p5 }
 0x358   : > { %p1531_p8 = pnand %p1530_p4, %p1526_p9 }
 0x3c2   : > { %v827_v26 = vpop.f32.mrf.mxu1 }
 0x3c3   : > { %832 = vst [vmem:[%s392_s23] sm:$0xff] %v827_v26 }
 0x3ca   : > { %v829_v27 = vpop.f32.mrf.mxu1 }
 0x3cb   : > { %833 = vst [vmem:[%s392_s23 + $0x8] sm:$0xff] %v829_v27 }
 0x3cc   : > { %1534 = shalt.err (!%p1531_p8)
}
 0x3cd   : > { %s1612_s16 = smov 128   ;;  %s1613_s24 = smov 8  }
 0x3ce   : > { %1259 = dma.vmem_to_hbm [thread:$0]  (%p1739_p7), %s880_s11, 256, %s882_s22, %s860_s18, %s1612_s16, %s1612_s16, %s1613_s24  }
 0x3cf PF: > { %s1916_s26 = sld [smem:[#allocation20_spill]]  ;;  %p1278_p10 = pnand %p1063_p11, %p1699_p6 }
 0x3d1   : > { %p1279_p12 = pneg %p1278_p10 }
 0x3d5   : > { %s910_s14 = sand.u32 1, %s1916_s26  }
 0x3d6   : > { %s911_s21 = scalar_lea.sflag [#allocation5], %s910_s14 }
 0x3d7   : > { %1576 = dma.done.wait (%p1279_p12), %s911_s21, 256  }
 0x3d8   : > { %1578 = vsyncadd (%p1279_p12), %s911_s21, 4294967040  ;;  %s921_s30 = scalar_lea.sflag [#allocation13], %s910_s14 }
 0x3d9   : > { %1580 = dma.done.wait (%p1279_p12), %s921_s30, 128  }
 0x3da   : > { %1582 = vsyncadd (%p1279_p12), %s921_s30, 4294967168  ;;  %s31_s29 = sadd.s32 1, %s1605_s29   ;;  %s1918_s13 = sld [smem:[#allocation21_spill]] }
 0x3db   : > { %p28_p13 = scmp.ge.s32.totalorder %s31_s29, 4   ;;  %s1919_s26 = sld [smem:[#allocation24_spill]] }
 0x3dc   : > { %s1920_s9 = sld [smem:[#allocation23_spill]]  ;;  %s1921_s24 = smov %s1589_s25 }
 0x3dd   : > { %s1923_s27 = smov %s1601_s28 }
 0x3de   :  { %30 = sbr.rel (!%p28_p13) target bundleno = 15 (0xf), region = 131 }
 0x3e0   : > { %s1922_s25 = smov %s1918_s13 }
 0x3e2   : > { %s1924_s28 = smov %s1920_s9 }
 0x3e3   :  { %927 = vsyncpa [#allocation4], 1 }
 0x3e4   :  { %929 = vsyncpa [#allocation4 + $0x1], 1 }
 0x3e5   :  { %930 = vsyncpa [#allocation7], 1 }
 0x3e6   :  { %932 = vsyncpa [#allocation7 + $0x1], 1 }
 0x3e7   :  { %933 = vsyncpa [#allocation10], 1 }
 0x3e8   :  { %934 = vsyncpa [#allocation5], 1 }
 0x3e9   :  { %936 = vsyncpa [#allocation5 + $0x1], 1 }
 0x3ea   :  { %937 = vsyncpa [#allocation13], 1 }
 0x3eb   :  { %939 = vsyncpa [#allocation13 + $0x1], 1 }

</bundles_post_ra>
